<compile_context>
chip_gen: v6e
topology: v6e:2x2x1
jax: 0.10.0
libtpu: 0.0.40
codegen_flags: <defaults>
</compile_context>

<pallas_src>
import functools

import jax
import jax.numpy as jnp
from jax.experimental import pallas as pl
from jax.experimental.pallas import tpu as pltpu

_EPS = 1e-5


def _round_up(a, m):
    return (a + m - 1) // m * m


def _pick_frames_per_block(N, HW, target_lanes=2048):
    """Frames per grid step: widen lanes, but keep >=2 grid steps (v7x 2 TCs)."""
    nb = max(1, target_lanes // HW)
    nb = min(nb, N)
    while N % nb:
        nb -= 1
    if N >= 2 and N // nb < 2:
        nb2 = nb
        while nb2 > 1 and N // nb2 < 2:
            nb2 -= 1
        while N % nb2:
            nb2 -= 1
        nb = nb2
    return nb


def _divmod_exact(p, d):
    """Exact nonnegative integer divmod via f32 reciprocal + one correction.

    Exact as long as the f32 quotient error is < 1 (true for any realistic
    frame size); avoids relying on vector integer div/mod lowering and is
    correct for non-power-of-two divisors.
    """
    q = (p.astype(jnp.float32) * (1.0 / float(d))).astype(jnp.int32)
    r = p - q * d
    q = jnp.where(r < 0, q - 1, q)
    q = jnp.where(r >= d, q + 1, q)
    return q, p - q * d


def _residual_kernel(*refs, K, H, W, NB, Cout, cin1_pad, cin2_pad, cout_grp,
                     has_proj, mm_dtype):
    """Fully fused residual block for NB frames (lane-stacked at b*HW)."""
    if has_proj:
        (x_ref, w1_ref, b1_ref, w2_ref, b2_ref, bs_ref, o_ref,
         s1_ref, s2_ref) = refs
    else:
        (x_ref, w1_ref, b1_ref, w2_ref, b2_ref, o_ref, s1_ref, s2_ref) = refs
        bs_ref = None

    HW = H * W
    pad = (K - 1) // 2

    # ---- spatial validity masks: built once, shared by both convs & frames --
    pos = jax.lax.broadcasted_iota(jnp.int32, (1, HW), 1)
    row, col = _divmod_exact(pos, W)
    row_lo = {d: row >= d for d in range(1, pad + 1)}
    row_hi = {d: row < H - d for d in range(1, pad + 1)}
    col_lo = {d: col >= d for d in range(1, pad + 1)}
    col_hi = {d: col < W - d for d in range(1, pad + 1)}

    taps = []   # (lane shift, combined validity mask or None) per KxK tap
    for kh in range(K):
        for kw in range(K):
            dh, dw = kh - pad, kw - pad
            shift = (-(dh * W + dw)) % HW
            parts = []
            if dh < 0:
                parts.append(row_lo[-dh])
            if dh > 0:
                parts.append(row_hi[dh])
            if dw < 0:
                parts.append(col_lo[-dw])
            if dw > 0:
                parts.append(col_hi[dw])
            m = None
            for p_ in parts:
                m = p_ if m is None else (m & p_)
            taps.append((shift, m))

    def stage_taps(frame, s_ref, cpad, b):
        """Write the K*K rolled+masked copies of one (C, HW) frame into the
        stacked scratch: sublane block t*cpad (8/16-aligned), lane block b*HW."""
        c = frame.shape[0]
        if c < cpad:
            # zero-pad channels once so every tap store is a full aligned tile
            frame = jnp.concatenate(
                [frame, jnp.zeros((cpad - c, HW), frame.dtype)], axis=0)
        for t, (shift, m) in enumerate(taps):
            v = pltpu.roll(frame, shift, 1) if shift else frame
            if m is not None:
                v = jnp.where(m, v, 0)
            s_ref[t * cpad:(t + 1) * cpad, b * HW:(b + 1) * HW] = v

    # ---- conv1 (+ folded BN) and 1x1 skip projection: ONE matmul ------------
    for b in range(NB):
        stage_taps(x_ref[b].astype(mm_dtype), s1_ref, cin1_pad, b)
    y_all = jnp.dot(w1_ref[...], s1_ref[...],
                    preferred_element_type=jnp.float32)          # (r1, NB*HW)
    y1 = jnp.maximum(y_all[0:Cout] + b1_ref[...], 0.0)            # ReLU, f32
    if has_proj:
        skip = y_all[cout_grp:cout_grp + Cout] + bs_ref[...]      # (Cout, NB*HW)

    # ---- conv2 (+ folded BN): ONE matmul ------------------------------------
    y1_mm = y1.astype(mm_dtype)        # single cast, hoisted out of tap loop
    for b in range(NB):
        stage_taps(y1_mm[:, b * HW:(b + 1) * HW], s2_ref, cin2_pad, b)
    y2 = (jnp.dot(w2_ref[...], s2_ref[...],
                  preferred_element_type=jnp.float32)[0:Cout] + b2_ref[...])

    # ---- residual add + final ReLU, lane-dense stores ------------------------
    for b in range(NB):
        yb = y2[:, b * HW:(b + 1) * HW]
        if has_proj:
            sb = skip[:, b * HW:(b + 1) * HW]
        else:
            sb = x_ref[b].astype(jnp.float32)      # identity skip (Cin == Cout)
        o_ref[b] = jnp.maximum(yb + sb, 0.0).astype(o_ref.dtype)


def fold_bn(w_oihw, gamma, beta, mean, var, eps=_EPS):
    """Fold eval-mode BatchNorm into the conv. Returns (w', b')."""
    scale = gamma / jnp.sqrt(var + eps)
    w = w_oihw * scale[:, None, None, None]
    b = beta - mean * scale
    return w, b


def _stack_conv_weights(w_oihw, cin_pad, rows, ws_11=None, skip_row_off=None):
    """Lay out folded KxK conv weights as (rows, K*K*cin_pad): tap-major column
    blocks (each Cin slice zero-padded to cin_pad), with the optional 1x1 skip
    projection appended as an extra row group that reads only the centre
    (unshifted) tap block, so skip rides on the same matmul."""
    Cout, Cin, K, _ = w_oihw.shape
    KK = K * K
    w_t = jnp.transpose(w_oihw, (2, 3, 0, 1)).reshape(KK, Cout, Cin)
    Wst = jnp.zeros((rows, KK * cin_pad), jnp.float32)
    for t in range(KK):
        Wst = Wst.at[:Cout, t * cin_pad:t * cin_pad + Cin].set(w_t[t])
    if ws_11 is not None:
        c = (K // 2) * K + (K // 2)
        Wst = Wst.at[skip_row_off:skip_row_off + Cout,
                     c * cin_pad:c * cin_pad + Cin].set(ws_11[:, :, 0, 0])
    return Wst


def residual_forward(x_nchw, w1, bn1, w2, bn2, wskip=None, bnskip=None, *,
                     k=3, stride=1, matmul_dtype=jnp.bfloat16,
                     frames_per_block=None, out_dtype=jnp.float32):
    """Pallas implementation of residual.forward (eval-mode BN). NCHW in/out.

    Note: on v5e with small channel counts prefer matmul_dtype=jnp.float32.
    """
    if stride != 1:
        # TODO(synk): strided (stride > 1) downsampling conv/skip path not implemented.
        raise NotImplementedError("stride > 1 not implemented")
    N, inc, H, W = x_nchw.shape
    ouc = w1.shape[0]
    HW = H * W
    KK = k * k
    has_proj = (stride != 1) or (inc != ouc)

    mm_dtype = jnp.dtype(matmul_dtype)
    pad_mult = max(8, 32 // mm_dtype.itemsize)        # 8 rows f32, 16 rows bf16
    cin1_pad = _round_up(inc, pad_mult)
    cin2_pad = _round_up(ouc, pad_mult)
    cout_grp = _round_up(ouc, 8)                       # f32-result row-group align

    nb = frames_per_block or _pick_frames_per_block(N, HW)
    assert N % nb == 0, (N, nb)

    # Free reshape only (no transpose); HBM input in the matmul dtype.
    x = x_nchw.reshape(N, inc, HW).astype(mm_dtype)

    fw1, fb1 = fold_bn(w1, *bn1)
    fw2, fb2 = fold_bn(w2, *bn2)
    if has_proj:
        fws, fbs = fold_bn(wskip, *bnskip)
        r1 = 2 * cout_grp                  # [conv1 rows | skip-projection rows]
        w1_st = _stack_conv_weights(fw1, cin1_pad, r1, ws_11=fws,
                                    skip_row_off=cout_grp)
    else:
        r1 = cout_grp
        w1_st = _stack_conv_weights(fw1, cin1_pad, r1)
    r2 = cout_grp
    w2_st = _stack_conv_weights(fw2, cin2_pad, r2)

    w1_st = w1_st.astype(mm_dtype)
    w2_st = w2_st.astype(mm_dtype)
    b1 = fb1.reshape(ouc, 1).astype(jnp.float32)
    b2 = fb2.reshape(ouc, 1).astype(jnp.float32)

    in_specs = [
        pl.BlockSpec((nb, inc, HW), lambda n: (n, 0, 0)),
        pl.BlockSpec((r1, KK * cin1_pad), lambda n: (0, 0)),
        pl.BlockSpec((ouc, 1), lambda n: (0, 0)),
        pl.BlockSpec((r2, KK * cin2_pad), lambda n: (0, 0)),
        pl.BlockSpec((ouc, 1), lambda n: (0, 0)),
    ]
    args = [x, w1_st, b1, w2_st, b2]
    if has_proj:
        in_specs.append(pl.BlockSpec((ouc, 1), lambda n: (0, 0)))
        args.append(fbs.reshape(ouc, 1).astype(jnp.float32))

    kernel = functools.partial(
        _residual_kernel, K=k, H=H, W=W, NB=nb, Cout=ouc,
        cin1_pad=cin1_pad, cin2_pad=cin2_pad, cout_grp=cout_grp,
        has_proj=has_proj, mm_dtype=mm_dtype)

    out_item = jnp.dtype(out_dtype).itemsize
    flops = 2 * N * HW * KK * (inc * ouc + ouc * ouc)
    if has_proj:
        flops += 2 * N * HW * inc * ouc
    bytes_accessed = (x.size * mm_dtype.itemsize
                      + N * ouc * HW * out_item
                      + (w1_st.size + w2_st.size) * mm_dtype.itemsize)
    resident = (2 * nb * inc * HW * mm_dtype.itemsize        # input (dbl-buffered)
                + 2 * nb * ouc * HW * out_item               # output (dbl-buffered)
                + (w1_st.size + w2_st.size) * mm_dtype.itemsize
                + KK * (cin1_pad + cin2_pad) * nb * HW * mm_dtype.itemsize
                + 8 * ouc * nb * HW * 4)                     # f32 intermediates
    vmem_limit = int(min(100 * 2**20, max(32 * 2**20, 2 * resident)))

    out = pl.pallas_call(
        kernel,
        out_shape=jax.ShapeDtypeStruct((N, ouc, HW), out_dtype),
        grid=(N // nb,),
        in_specs=in_specs,
        out_specs=pl.BlockSpec((nb, ouc, HW), lambda n: (n, 0, 0)),
        scratch_shapes=[
            pltpu.VMEM((KK * cin1_pad, nb * HW), mm_dtype),
            pltpu.VMEM((KK * cin2_pad, nb * HW), mm_dtype),
        ],
        compiler_params=pltpu.CompilerParams(
            dimension_semantics=("parallel",),
            vmem_limit_bytes=vmem_limit),
        cost_estimate=pl.CostEstimate(
            flops=flops, transcendentals=0, bytes_accessed=bytes_accessed),
    )(*args)
    return out.reshape(N, ouc, H, W)


# ---------------- reference (pure JAX, for verification) ----------------
def _conv_bn_ref(x_nchw, w_oihw, gamma, beta, mean, var, pad, relu, eps=_EPS):
    y = jax.lax.conv_general_dilated(
        x_nchw, w_oihw, window_strides=(1, 1),
        padding=[(pad, pad), (pad, pad)],
        dimension_numbers=("NCHW", "OIHW", "NCHW"))
    scale = gamma / jnp.sqrt(var + eps)
    y = y * scale[None, :, None, None] + (beta - mean * scale)[None, :, None, None]
    return jnp.maximum(y, 0.0) if relu else y


def residual_ref(x, w1, bn1, w2, bn2, ws, bns, k=3):
    p = (k - 1) // 2
    inc, ouc = x.shape[1], w1.shape[0]
    skip = x if inc == ouc else _conv_bn_ref(x, ws, *bns, 0, False)
    y1 = _conv_bn_ref(x, w1, *bn1, p, True)
    y2 = _conv_bn_ref(y1, w2, *bn2, p, False)
    return jnp.maximum(y2 + skip, 0.0)


if __name__ == "__main__":
    N, inc, ouc, H, W, k = 2, 4, 8, 16, 16, 3

    key = jax.random.PRNGKey(0)
    keys = jax.random.split(key, 28)

    def bn_params(k1, k2, k3, k4, c):
        gamma = 0.9 + 0.2 * jax.random.uniform(k1, (c,), jnp.float32)
        beta = 0.1 * jax.random.normal(k2, (c,), jnp.float32)
        mean = 0.1 * jax.random.normal(k3, (c,), jnp.float32)
        var = 0.5 + jax.random.uniform(k4, (c,), jnp.float32)
        return gamma, beta, mean, var

    # ---- config A: projection skip (inc != ouc) ----
    w1 = 0.1 * jax.random.normal(keys[0], (ouc, inc, k, k), jnp.float32)
    bn1 = bn_params(keys[1], keys[2], keys[3], keys[4], ouc)
    w2 = 0.1 * jax.random.normal(keys[5], (ouc, ouc, k, k), jnp.float32)
    bn2 = bn_params(keys[6], keys[7], keys[8], keys[9], ouc)
    ws = 0.1 * jax.random.normal(keys[10], (ouc, inc, 1, 1), jnp.float32)
    bns = bn_params(keys[11], keys[12], keys[13], keys[14], ouc)
    x = jax.random.normal(keys[15], (N, inc, H, W), jnp.float32)

    ref = residual_ref(x, w1, bn1, w2, bn2, ws, bns, k=k)

    out32 = jax.block_until_ready(
        residual_forward(x, w1, bn1, w2, bn2, ws, bns, k=k,
                         matmul_dtype=jnp.float32))
    assert out32.shape == (N, ouc, H, W), out32.shape
    err32 = float(jnp.max(jnp.abs(out32 - ref)))
    assert err32 < 1e-4, f"f32 path mismatch vs reference: {err32}"

    outbf = jax.block_until_ready(
        residual_forward(x, w1, bn1, w2, bn2, ws, bns, k=k,
                         matmul_dtype=jnp.bfloat16))
    errbf = float(jnp.max(jnp.abs(outbf - ref)))
    assert errbf < 5e-2, f"bf16 path mismatch vs reference: {errbf}"

    # ---- config B: identity skip (inc == ouc) ----
    w1b = 0.1 * jax.random.normal(keys[16], (ouc, ouc, k, k), jnp.float32)
    bn1b = bn_params(keys[17], keys[18], keys[19], keys[20], ouc)
    w2b = 0.1 * jax.random.normal(keys[21], (ouc, ouc, k, k), jnp.float32)
    bn2b = bn_params(keys[22], keys[23], keys[24], keys[25], ouc)
    x2 = jax.random.normal(keys[26], (N, ouc, H, W), jnp.float32)

    ref2 = residual_ref(x2, w1b, bn1b, w2b, bn2b, None, None, k=k)
    out2 = jax.block_until_ready(
        residual_forward(x2, w1b, bn1b, w2b, bn2b, k=k,
                         matmul_dtype=jnp.float32))
    err2 = float(jnp.max(jnp.abs(out2 - ref2)))
    assert err2 < 1e-4, f"identity-skip mismatch vs reference: {err2}"

    # ---- config C: larger batch (N=4) exercises multi-frame lane folding ----
    x3 = jax.random.normal(keys[27], (4, inc, H, W), jnp.float32)
    ref3 = residual_ref(x3, w1, bn1, w2, bn2, ws, bns, k=k)
    out3 = jax.block_until_ready(
        residual_forward(x3, w1, bn1, w2, bn2, ws, bns, k=k,
                         matmul_dtype=jnp.float32))
    err3 = float(jnp.max(jnp.abs(out3 - ref3)))
    assert err3 < 1e-4, f"batched-lane-fold mismatch vs reference: {err3}"

    print("KERNEL_OK")
</pallas_src>

<mosaic_0001>
module attributes {stable_mosaic.version = 11 : i64} {
  func.func @_residual_kernel(%arg0: i32, %arg1: memref<1x4x256xf32, #tpu.memory_space<vmem>>, %arg2: memref<16x72xf32, #tpu.memory_space<vmem>>, %arg3: memref<8x1xf32, #tpu.memory_space<vmem>>, %arg4: memref<8x72xf32, #tpu.memory_space<vmem>>, %arg5: memref<8x1xf32, #tpu.memory_space<vmem>>, %arg6: memref<8x1xf32, #tpu.memory_space<vmem>>, %arg7: memref<1x8x256xf32, #tpu.memory_space<vmem>>, %arg8: memref<72x256xf32, #tpu.memory_space<vmem>>, %arg9: memref<72x256xf32, #tpu.memory_space<vmem>>) attributes {dimension_semantics = [#tpu.dimension_semantics<parallel>], iteration_bounds = array<i64: 2>, scalar_prefetch = 0 : i64, scratch_operands = 2 : i64, tpu.core_type = #tpu.core_type<tc>, window_params = [{transform_indices = @transform_0, window_bounds = array<i64: 1, 4, 256>}, {pipeline_mode = #tpu.pipeline_mode<synchronous>, transform_indices = @transform_1, window_bounds = array<i64: 16, 72>}, {pipeline_mode = #tpu.pipeline_mode<synchronous>, transform_indices = @transform_2, window_bounds = array<i64: 8, 1>}, {pipeline_mode = #tpu.pipeline_mode<synchronous>, transform_indices = @transform_3, window_bounds = array<i64: 8, 72>}, {pipeline_mode = #tpu.pipeline_mode<synchronous>, transform_indices = @transform_4, window_bounds = array<i64: 8, 1>}, {pipeline_mode = #tpu.pipeline_mode<synchronous>, transform_indices = @transform_5, window_bounds = array<i64: 8, 1>}, {transform_indices = @transform_6, window_bounds = array<i64: 1, 8, 256>}]} {
    %0 = tpu.iota {dimensions = array<i32: 1>} : vector<1x256xi32>
    %1 = arith.sitofp %0 : vector<1x256xi32> to vector<1x256xf32>
    %cst = arith.constant 6.250000e-02 : f32
    %2 = vector.broadcast %cst : f32 to vector<1x256xf32>
    %3 = arith.mulf %1, %2 : vector<1x256xf32>
    %4 = arith.fptosi %3 : vector<1x256xf32> to vector<1x256xi32>
    %c16_i32 = arith.constant 16 : i32
    %5 = vector.broadcast %c16_i32 : i32 to vector<1x256xi32>
    %6 = arith.muli %4, %5 : vector<1x256xi32>
    %7 = arith.subi %0, %6 : vector<1x256xi32>
    %c0_i32 = arith.constant 0 : i32
    %8 = vector.broadcast %c0_i32 : i32 to vector<1x256xi32>
    %9 = arith.cmpi slt, %7, %8 : vector<1x256xi32>
    %c1_i32 = arith.constant 1 : i32
    %10 = vector.broadcast %c1_i32 : i32 to vector<1x256xi32>
    %11 = arith.subi %4, %10 : vector<1x256xi32>
    %12 = arith.select %9, %11, %4 : vector<1x256xi1>, vector<1x256xi32>
    %c16_i32_0 = arith.constant 16 : i32
    %13 = vector.broadcast %c16_i32_0 : i32 to vector<1x256xi32>
    %14 = arith.cmpi sge, %7, %13 : vector<1x256xi32>
    %c1_i32_1 = arith.constant 1 : i32
    %15 = vector.broadcast %c1_i32_1 : i32 to vector<1x256xi32>
    %16 = arith.addi %12, %15 : vector<1x256xi32>
    %17 = arith.select %14, %16, %12 : vector<1x256xi1>, vector<1x256xi32>
    %c16_i32_2 = arith.constant 16 : i32
    %18 = vector.broadcast %c16_i32_2 : i32 to vector<1x256xi32>
    %19 = arith.muli %17, %18 : vector<1x256xi32>
    %20 = arith.subi %0, %19 : vector<1x256xi32>
    %c1_i32_3 = arith.constant 1 : i32
    %21 = vector.broadcast %c1_i32_3 : i32 to vector<1x256xi32>
    %22 = arith.cmpi sge, %17, %21 : vector<1x256xi32>
    %c15_i32 = arith.constant 15 : i32
    %23 = vector.broadcast %c15_i32 : i32 to vector<1x256xi32>
    %24 = arith.cmpi slt, %17, %23 : vector<1x256xi32>
    %c1_i32_4 = arith.constant 1 : i32
    %25 = vector.broadcast %c1_i32_4 : i32 to vector<1x256xi32>
    %26 = arith.cmpi sge, %20, %25 : vector<1x256xi32>
    %c15_i32_5 = arith.constant 15 : i32
    %27 = vector.broadcast %c15_i32_5 : i32 to vector<1x256xi32>
    %28 = arith.cmpi slt, %20, %27 : vector<1x256xi32>
    %29 = arith.andi %22, %26 : vector<1x256xi1>
    %30 = arith.andi %22, %28 : vector<1x256xi1>
    %31 = arith.andi %24, %26 : vector<1x256xi1>
    %32 = arith.andi %24, %28 : vector<1x256xi1>
    %c0 = arith.constant 0 : index
    %c0_6 = arith.constant 0 : index
    %c0_7 = arith.constant 0 : index
    %33 = vector.load %arg1[%c0, %c0_6, %c0_7] : memref<1x4x256xf32, #tpu.memory_space<vmem>>, vector<1x4x256xf32>
    %34 = vector.shape_cast %33 : vector<1x4x256xf32> to vector<4x256xf32>
    %cst_8 = arith.constant 0.000000e+00 : f32
    %35 = vector.broadcast %cst_8 : f32 to vector<4x256xf32>
    %36 = tpu.concatenate %34, %35 in 0 : vector<4x256xf32>, vector<4x256xf32> -> vector<8x256xf32>
    %c17_i32 = arith.constant 17 : i32
    %37 = tpu.dynamic_rotate %36 by %c17_i32 dim 1 : vector<8x256xf32>, i32 -> vector<8x256xf32>
    %c0_i32_9 = arith.constant 0 : i32
    %38 = arith.sitofp %c0_i32_9 : i32 to f32
    %39 = vector.shape_cast %29 : vector<1x256xi1> to vector<1x256xi1>
    %40 = vector.broadcast %39 : vector<1x256xi1> to vector<8x256xi1>
    %41 = vector.broadcast %38 : f32 to vector<8x256xf32>
    %42 = arith.select %40, %37, %41 : vector<8x256xi1>, vector<8x256xf32>
    %c0_10 = arith.constant 0 : index
    %c0_11 = arith.constant 0 : index
    %43 = vector.load %arg8[%c0_10, %c0_11] : memref<72x256xf32, #tpu.memory_space<vmem>>, vector<8x256xf32>
    tpu.vector_store %arg8[%c0_10, %c0_11], %42 {strides = array<i32>} : memref<72x256xf32, #tpu.memory_space<vmem>>, vector<8x256xf32>,
    %c16_i32_12 = arith.constant 16 : i32
    %44 = tpu.dynamic_rotate %36 by %c16_i32_12 dim 1 : vector<8x256xf32>, i32 -> vector<8x256xf32>
    %c0_i32_13 = arith.constant 0 : i32
    %45 = arith.sitofp %c0_i32_13 : i32 to f32
    %46 = vector.shape_cast %22 : vector<1x256xi1> to vector<1x256xi1>
    %47 = vector.broadcast %46 : vector<1x256xi1> to vector<8x256xi1>
    %48 = vector.broadcast %45 : f32 to vector<8x256xf32>
    %49 = arith.select %47, %44, %48 : vector<8x256xi1>, vector<8x256xf32>
    %c8 = arith.constant 8 : index
    %c0_14 = arith.constant 0 : index
    %50 = vector.load %arg8[%c8, %c0_14] : memref<72x256xf32, #tpu.memory_space<vmem>>, vector<8x256xf32>
    tpu.vector_store %arg8[%c8, %c0_14], %49 {strides = array<i32>} : memref<72x256xf32, #tpu.memory_space<vmem>>, vector<8x256xf32>,
    %c15_i32_15 = arith.constant 15 : i32
    %51 = tpu.dynamic_rotate %36 by %c15_i32_15 dim 1 : vector<8x256xf32>, i32 -> vector<8x256xf32>
    %c0_i32_16 = arith.constant 0 : i32
    %52 = arith.sitofp %c0_i32_16 : i32 to f32
    %53 = vector.shape_cast %30 : vector<1x256xi1> to vector<1x256xi1>
    %54 = vector.broadcast %53 : vector<1x256xi1> to vector<8x256xi1>
    %55 = vector.broadcast %52 : f32 to vector<8x256xf32>
    %56 = arith.select %54, %51, %55 : vector<8x256xi1>, vector<8x256xf32>
    %c16 = arith.constant 16 : index
    %c0_17 = arith.constant 0 : index
    %57 = vector.load %arg8[%c16, %c0_17] : memref<72x256xf32, #tpu.memory_space<vmem>>, vector<8x256xf32>
    tpu.vector_store %arg8[%c16, %c0_17], %56 {strides = array<i32>} : memref<72x256xf32, #tpu.memory_space<vmem>>, vector<8x256xf32>,
    %c1_i32_18 = arith.constant 1 : i32
    %58 = tpu.dynamic_rotate %36 by %c1_i32_18 dim 1 : vector<8x256xf32>, i32 -> vector<8x256xf32>
    %c0_i32_19 = arith.constant 0 : i32
    %59 = arith.sitofp %c0_i32_19 : i32 to f32
    %60 = vector.shape_cast %26 : vector<1x256xi1> to vector<1x256xi1>
    %61 = vector.broadcast %60 : vector<1x256xi1> to vector<8x256xi1>
    %62 = vector.broadcast %59 : f32 to vector<8x256xf32>
    %63 = arith.select %61, %58, %62 : vector<8x256xi1>, vector<8x256xf32>
    %c24 = arith.constant 24 : index
    %c0_20 = arith.constant 0 : index
    %64 = vector.load %arg8[%c24, %c0_20] : memref<72x256xf32, #tpu.memory_space<vmem>>, vector<8x256xf32>
    tpu.vector_store %arg8[%c24, %c0_20], %63 {strides = array<i32>} : memref<72x256xf32, #tpu.memory_space<vmem>>, vector<8x256xf32>,
    %c32 = arith.constant 32 : index
    %c0_21 = arith.constant 0 : index
    %65 = vector.load %arg8[%c32, %c0_21] : memref<72x256xf32, #tpu.memory_space<vmem>>, vector<8x256xf32>
    tpu.vector_store %arg8[%c32, %c0_21], %36 {strides = array<i32>} : memref<72x256xf32, #tpu.memory_space<vmem>>, vector<8x256xf32>,
    %c255_i32 = arith.constant 255 : i32
    %66 = tpu.dynamic_rotate %36 by %c255_i32 dim 1 : vector<8x256xf32>, i32 -> vector<8x256xf32>
    %c0_i32_22 = arith.constant 0 : i32
    %67 = arith.sitofp %c0_i32_22 : i32 to f32
    %68 = vector.shape_cast %28 : vector<1x256xi1> to vector<1x256xi1>
    %69 = vector.broadcast %68 : vector<1x256xi1> to vector<8x256xi1>
    %70 = vector.broadcast %67 : f32 to vector<8x256xf32>
    %71 = arith.select %69, %66, %70 : vector<8x256xi1>, vector<8x256xf32>
    %c40 = arith.constant 40 : index
    %c0_23 = arith.constant 0 : index
    %72 = vector.load %arg8[%c40, %c0_23] : memref<72x256xf32, #tpu.memory_space<vmem>>, vector<8x256xf32>
    tpu.vector_store %arg8[%c40, %c0_23], %71 {strides = array<i32>} : memref<72x256xf32, #tpu.memory_space<vmem>>, vector<8x256xf32>,
    %c241_i32 = arith.constant 241 : i32
    %73 = tpu.dynamic_rotate %36 by %c241_i32 dim 1 : vector<8x256xf32>, i32 -> vector<8x256xf32>
    %c0_i32_24 = arith.constant 0 : i32
    %74 = arith.sitofp %c0_i32_24 : i32 to f32
    %75 = vector.shape_cast %31 : vector<1x256xi1> to vector<1x256xi1>
    %76 = vector.broadcast %75 : vector<1x256xi1> to vector<8x256xi1>
    %77 = vector.broadcast %74 : f32 to vector<8x256xf32>
    %78 = arith.select %76, %73, %77 : vector<8x256xi1>, vector<8x256xf32>
    %c48 = arith.constant 48 : index
    %c0_25 = arith.constant 0 : index
    %79 = vector.load %arg8[%c48, %c0_25] : memref<72x256xf32, #tpu.memory_space<vmem>>, vector<8x256xf32>
    tpu.vector_store %arg8[%c48, %c0_25], %78 {strides = array<i32>} : memref<72x256xf32, #tpu.memory_space<vmem>>, vector<8x256xf32>,
    %c240_i32 = arith.constant 240 : i32
    %80 = tpu.dynamic_rotate %36 by %c240_i32 dim 1 : vector<8x256xf32>, i32 -> vector<8x256xf32>
    %c0_i32_26 = arith.constant 0 : i32
    %81 = arith.sitofp %c0_i32_26 : i32 to f32
    %82 = vector.shape_cast %24 : vector<1x256xi1> to vector<1x256xi1>
    %83 = vector.broadcast %82 : vector<1x256xi1> to vector<8x256xi1>
    %84 = vector.broadcast %81 : f32 to vector<8x256xf32>
    %85 = arith.select %83, %80, %84 : vector<8x256xi1>, vector<8x256xf32>
    %c56 = arith.constant 56 : index
    %c0_27 = arith.constant 0 : index
    %86 = vector.load %arg8[%c56, %c0_27] : memref<72x256xf32, #tpu.memory_space<vmem>>, vector<8x256xf32>
    tpu.vector_store %arg8[%c56, %c0_27], %85 {strides = array<i32>} : memref<72x256xf32, #tpu.memory_space<vmem>>, vector<8x256xf32>,
    %c239_i32 = arith.constant 239 : i32
    %87 = tpu.dynamic_rotate %36 by %c239_i32 dim 1 : vector<8x256xf32>, i32 -> vector<8x256xf32>
    %c0_i32_28 = arith.constant 0 : i32
    %88 = arith.sitofp %c0_i32_28 : i32 to f32
    %89 = vector.shape_cast %32 : vector<1x256xi1> to vector<1x256xi1>
    %90 = vector.broadcast %89 : vector<1x256xi1> to vector<8x256xi1>
    %91 = vector.broadcast %88 : f32 to vector<8x256xf32>
    %92 = arith.select %90, %87, %91 : vector<8x256xi1>, vector<8x256xf32>
    %c64 = arith.constant 64 : index
    %c0_29 = arith.constant 0 : index
    %93 = vector.load %arg8[%c64, %c0_29] : memref<72x256xf32, #tpu.memory_space<vmem>>, vector<8x256xf32>
    tpu.vector_store %arg8[%c64, %c0_29], %92 {strides = array<i32>} : memref<72x256xf32, #tpu.memory_space<vmem>>, vector<8x256xf32>,
    %c0_30 = arith.constant 0 : index
    %c0_31 = arith.constant 0 : index
    %94 = vector.load %arg2[%c0_30, %c0_31] : memref<16x72xf32, #tpu.memory_space<vmem>>, vector<16x72xf32>
    %c0_32 = arith.constant 0 : index
    %c0_33 = arith.constant 0 : index
    %95 = vector.load %arg8[%c0_32, %c0_33] : memref<72x256xf32, #tpu.memory_space<vmem>>, vector<72x256xf32>
    %cst_34 = arith.constant dense<0.000000e+00> : vector<16x256xf32>
    %96 = tpu.matmul %94, %95, %cst_34 {dimension_numbers = #tpu.dot_dimension_numbers<[1], [0], [0], [1], [0, 0, 1, 1], [], []>} : vector<16x72xf32>, vector<72x256xf32>, vector<16x256xf32> -> vector<16x256xf32>
    %97 = vector.extract_strided_slice %96 {offsets = [0, 0], sizes = [8, 256], strides = [1, 1]} : vector<16x256xf32> to vector<8x256xf32>
    %c0_35 = arith.constant 0 : index
    %c0_36 = arith.constant 0 : index
    %98 = vector.load %arg3[%c0_35, %c0_36] : memref<8x1xf32, #tpu.memory_space<vmem>>, vector<8x1xf32>
    %99 = vector.broadcast %98 : vector<8x1xf32> to vector<8x256xf32>
    %100 = arith.addf %97, %99 : vector<8x256xf32>
    %cst_37 = arith.constant 0.000000e+00 : f32
    %101 = vector.broadcast %cst_37 : f32 to vector<8x256xf32>
    %102 = arith.maximumf %100, %101 : vector<8x256xf32>
    %103 = vector.extract_strided_slice %96 {offsets = [8, 0], sizes = [8, 256], strides = [1, 1]} : vector<16x256xf32> to vector<8x256xf32>
    %c0_38 = arith.constant 0 : index
    %c0_39 = arith.constant 0 : index
    %104 = vector.load %arg6[%c0_38, %c0_39] : memref<8x1xf32, #tpu.memory_space<vmem>>, vector<8x1xf32>
    %105 = vector.broadcast %104 : vector<8x1xf32> to vector<8x256xf32>
    %106 = arith.addf %103, %105 : vector<8x256xf32>
    %c17_i32_40 = arith.constant 17 : i32
    %107 = tpu.dynamic_rotate %102 by %c17_i32_40 dim 1 : vector<8x256xf32>, i32 -> vector<8x256xf32>
    %c0_i32_41 = arith.constant 0 : i32
    %108 = arith.sitofp %c0_i32_41 : i32 to f32
    %109 = vector.shape_cast %29 : vector<1x256xi1> to vector<1x256xi1>
    %110 = vector.broadcast %109 : vector<1x256xi1> to vector<8x256xi1>
    %111 = vector.broadcast %108 : f32 to vector<8x256xf32>
    %112 = arith.select %110, %107, %111 : vector<8x256xi1>, vector<8x256xf32>
    %c0_42 = arith.constant 0 : index
    %c0_43 = arith.constant 0 : index
    %113 = vector.load %arg9[%c0_42, %c0_43] : memref<72x256xf32, #tpu.memory_space<vmem>>, vector<8x256xf32>
    tpu.vector_store %arg9[%c0_42, %c0_43], %112 {strides = array<i32>} : memref<72x256xf32, #tpu.memory_space<vmem>>, vector<8x256xf32>,
    %c16_i32_44 = arith.constant 16 : i32
    %114 = tpu.dynamic_rotate %102 by %c16_i32_44 dim 1 : vector<8x256xf32>, i32 -> vector<8x256xf32>
    %c0_i32_45 = arith.constant 0 : i32
    %115 = arith.sitofp %c0_i32_45 : i32 to f32
    %116 = vector.shape_cast %22 : vector<1x256xi1> to vector<1x256xi1>
    %117 = vector.broadcast %116 : vector<1x256xi1> to vector<8x256xi1>
    %118 = vector.broadcast %115 : f32 to vector<8x256xf32>
    %119 = arith.select %117, %114, %118 : vector<8x256xi1>, vector<8x256xf32>
    %c8_46 = arith.constant 8 : index
    %c0_47 = arith.constant 0 : index
    %120 = vector.load %arg9[%c8_46, %c0_47] : memref<72x256xf32, #tpu.memory_space<vmem>>, vector<8x256xf32>
    tpu.vector_store %arg9[%c8_46, %c0_47], %119 {strides = array<i32>} : memref<72x256xf32, #tpu.memory_space<vmem>>, vector<8x256xf32>,
    %c15_i32_48 = arith.constant 15 : i32
    %121 = tpu.dynamic_rotate %102 by %c15_i32_48 dim 1 : vector<8x256xf32>, i32 -> vector<8x256xf32>
    %c0_i32_49 = arith.constant 0 : i32
    %122 = arith.sitofp %c0_i32_49 : i32 to f32
    %123 = vector.shape_cast %30 : vector<1x256xi1> to vector<1x256xi1>
    %124 = vector.broadcast %123 : vector<1x256xi1> to vector<8x256xi1>
    %125 = vector.broadcast %122 : f32 to vector<8x256xf32>
    %126 = arith.select %124, %121, %125 : vector<8x256xi1>, vector<8x256xf32>
    %c16_50 = arith.constant 16 : index
    %c0_51 = arith.constant 0 : index
    %127 = vector.load %arg9[%c16_50, %c0_51] : memref<72x256xf32, #tpu.memory_space<vmem>>, vector<8x256xf32>
    tpu.vector_store %arg9[%c16_50, %c0_51], %126 {strides = array<i32>} : memref<72x256xf32, #tpu.memory_space<vmem>>, vector<8x256xf32>,
    %c1_i32_52 = arith.constant 1 : i32
    %128 = tpu.dynamic_rotate %102 by %c1_i32_52 dim 1 : vector<8x256xf32>, i32 -> vector<8x256xf32>
    %c0_i32_53 = arith.constant 0 : i32
    %129 = arith.sitofp %c0_i32_53 : i32 to f32
    %130 = vector.shape_cast %26 : vector<1x256xi1> to vector<1x256xi1>
    %131 = vector.broadcast %130 : vector<1x256xi1> to vector<8x256xi1>
    %132 = vector.broadcast %129 : f32 to vector<8x256xf32>
    %133 = arith.select %131, %128, %132 : vector<8x256xi1>, vector<8x256xf32>
    %c24_54 = arith.constant 24 : index
    %c0_55 = arith.constant 0 : index
    %134 = vector.load %arg9[%c24_54, %c0_55] : memref<72x256xf32, #tpu.memory_space<vmem>>, vector<8x256xf32>
    tpu.vector_store %arg9[%c24_54, %c0_55], %133 {strides = array<i32>} : memref<72x256xf32, #tpu.memory_space<vmem>>, vector<8x256xf32>,
    %c32_56 = arith.constant 32 : index
    %c0_57 = arith.constant 0 : index
    %135 = vector.load %arg9[%c32_56, %c0_57] : memref<72x256xf32, #tpu.memory_space<vmem>>, vector<8x256xf32>
    tpu.vector_store %arg9[%c32_56, %c0_57], %102 {strides = array<i32>} : memref<72x256xf32, #tpu.memory_space<vmem>>, vector<8x256xf32>,
    %c255_i32_58 = arith.constant 255 : i32
    %136 = tpu.dynamic_rotate %102 by %c255_i32_58 dim 1 : vector<8x256xf32>, i32 -> vector<8x256xf32>
    %c0_i32_59 = arith.constant 0 : i32
    %137 = arith.sitofp %c0_i32_59 : i32 to f32
    %138 = vector.shape_cast %28 : vector<1x256xi1> to vector<1x256xi1>
    %139 = vector.broadcast %138 : vector<1x256xi1> to vector<8x256xi1>
    %140 = vector.broadcast %137 : f32 to vector<8x256xf32>
    %141 = arith.select %139, %136, %140 : vector<8x256xi1>, vector<8x256xf32>
    %c40_60 = arith.constant 40 : index
    %c0_61 = arith.constant 0 : index
    %142 = vector.load %arg9[%c40_60, %c0_61] : memref<72x256xf32, #tpu.memory_space<vmem>>, vector<8x256xf32>
    tpu.vector_store %arg9[%c40_60, %c0_61], %141 {strides = array<i32>} : memref<72x256xf32, #tpu.memory_space<vmem>>, vector<8x256xf32>,
    %c241_i32_62 = arith.constant 241 : i32
    %143 = tpu.dynamic_rotate %102 by %c241_i32_62 dim 1 : vector<8x256xf32>, i32 -> vector<8x256xf32>
    %c0_i32_63 = arith.constant 0 : i32
    %144 = arith.sitofp %c0_i32_63 : i32 to f32
    %145 = vector.shape_cast %31 : vector<1x256xi1> to vector<1x256xi1>
    %146 = vector.broadcast %145 : vector<1x256xi1> to vector<8x256xi1>
    %147 = vector.broadcast %144 : f32 to vector<8x256xf32>
    %148 = arith.select %146, %143, %147 : vector<8x256xi1>, vector<8x256xf32>
    %c48_64 = arith.constant 48 : index
    %c0_65 = arith.constant 0 : index
    %149 = vector.load %arg9[%c48_64, %c0_65] : memref<72x256xf32, #tpu.memory_space<vmem>>, vector<8x256xf32>
    tpu.vector_store %arg9[%c48_64, %c0_65], %148 {strides = array<i32>} : memref<72x256xf32, #tpu.memory_space<vmem>>, vector<8x256xf32>,
    %c240_i32_66 = arith.constant 240 : i32
    %150 = tpu.dynamic_rotate %102 by %c240_i32_66 dim 1 : vector<8x256xf32>, i32 -> vector<8x256xf32>
    %c0_i32_67 = arith.constant 0 : i32
    %151 = arith.sitofp %c0_i32_67 : i32 to f32
    %152 = vector.shape_cast %24 : vector<1x256xi1> to vector<1x256xi1>
    %153 = vector.broadcast %152 : vector<1x256xi1> to vector<8x256xi1>
    %154 = vector.broadcast %151 : f32 to vector<8x256xf32>
    %155 = arith.select %153, %150, %154 : vector<8x256xi1>, vector<8x256xf32>
    %c56_68 = arith.constant 56 : index
    %c0_69 = arith.constant 0 : index
    %156 = vector.load %arg9[%c56_68, %c0_69] : memref<72x256xf32, #tpu.memory_space<vmem>>, vector<8x256xf32>
    tpu.vector_store %arg9[%c56_68, %c0_69], %155 {strides = array<i32>} : memref<72x256xf32, #tpu.memory_space<vmem>>, vector<8x256xf32>,
    %c239_i32_70 = arith.constant 239 : i32
    %157 = tpu.dynamic_rotate %102 by %c239_i32_70 dim 1 : vector<8x256xf32>, i32 -> vector<8x256xf32>
    %c0_i32_71 = arith.constant 0 : i32
    %158 = arith.sitofp %c0_i32_71 : i32 to f32
    %159 = vector.shape_cast %32 : vector<1x256xi1> to vector<1x256xi1>
    %160 = vector.broadcast %159 : vector<1x256xi1> to vector<8x256xi1>
    %161 = vector.broadcast %158 : f32 to vector<8x256xf32>
    %162 = arith.select %160, %157, %161 : vector<8x256xi1>, vector<8x256xf32>
    %c64_72 = arith.constant 64 : index
    %c0_73 = arith.constant 0 : index
    %163 = vector.load %arg9[%c64_72, %c0_73] : memref<72x256xf32, #tpu.memory_space<vmem>>, vector<8x256xf32>
    tpu.vector_store %arg9[%c64_72, %c0_73], %162 {strides = array<i32>} : memref<72x256xf32, #tpu.memory_space<vmem>>, vector<8x256xf32>,
    %c0_74 = arith.constant 0 : index
    %c0_75 = arith.constant 0 : index
    %164 = vector.load %arg4[%c0_74, %c0_75] : memref<8x72xf32, #tpu.memory_space<vmem>>, vector<8x72xf32>
    %c0_76 = arith.constant 0 : index
    %c0_77 = arith.constant 0 : index
    %165 = vector.load %arg9[%c0_76, %c0_77] : memref<72x256xf32, #tpu.memory_space<vmem>>, vector<72x256xf32>
    %cst_78 = arith.constant dense<0.000000e+00> : vector<8x256xf32>
    %166 = tpu.matmul %164, %165, %cst_78 {dimension_numbers = #tpu.dot_dimension_numbers<[1], [0], [0], [1], [0, 0, 1, 1], [], []>} : vector<8x72xf32>, vector<72x256xf32>, vector<8x256xf32> -> vector<8x256xf32>
    %c0_79 = arith.constant 0 : index
    %c0_80 = arith.constant 0 : index
    %167 = vector.load %arg5[%c0_79, %c0_80] : memref<8x1xf32, #tpu.memory_space<vmem>>, vector<8x1xf32>
    %168 = vector.broadcast %167 : vector<8x1xf32> to vector<8x256xf32>
    %169 = arith.addf %166, %168 : vector<8x256xf32>
    %170 = arith.addf %169, %106 : vector<8x256xf32>
    %cst_81 = arith.constant 0.000000e+00 : f32
    %171 = vector.broadcast %cst_81 : f32 to vector<8x256xf32>
    %172 = arith.maximumf %170, %171 : vector<8x256xf32>
    %c0_82 = arith.constant 0 : index
    %c0_83 = arith.constant 0 : index
    %c0_84 = arith.constant 0 : index
    %173 = vector.load %arg7[%c0_82, %c0_83, %c0_84] : memref<1x8x256xf32, #tpu.memory_space<vmem>>, vector<1x8x256xf32>
    %174 = vector.shape_cast %173 : vector<1x8x256xf32> to vector<8x256xf32>
    %175 = vector.shape_cast %172 : vector<8x256xf32> to vector<1x8x256xf32>
    tpu.vector_store %arg7[%c0_82, %c0_83, %c0_84], %175 {strides = array<i32>} : memref<1x8x256xf32, #tpu.memory_space<vmem>>, vector<1x8x256xf32>,
    return
  }
  func.func @transform_0(%arg0: i32) -> (i32, i32, i32) {
    %c0_i32 = arith.constant 0 : i32
    %c0_i32_0 = arith.constant 0 : i32
    %c0_i32_1 = arith.constant 0 : i32
    return %arg0, %c0_i32, %c0_i32_0 : i32, i32, i32
  }
  func.func @transform_1(%arg0: i32) -> (i32, i32) {
    %c0_i32 = arith.constant 0 : i32
    %c0_i32_0 = arith.constant 0 : i32
    %c0_i32_1 = arith.constant 0 : i32
    return %c0_i32, %c0_i32_0 : i32, i32
  }
  func.func @transform_2(%arg0: i32) -> (i32, i32) {
    %c0_i32 = arith.constant 0 : i32
    %c0_i32_0 = arith.constant 0 : i32
    %c0_i32_1 = arith.constant 0 : i32
    return %c0_i32, %c0_i32_0 : i32, i32
  }
  func.func @transform_3(%arg0: i32) -> (i32, i32) {
    %c0_i32 = arith.constant 0 : i32
    %c0_i32_0 = arith.constant 0 : i32
    %c0_i32_1 = arith.constant 0 : i32
    return %c0_i32, %c0_i32_0 : i32, i32
  }
  func.func @transform_4(%arg0: i32) -> (i32, i32) {
    %c0_i32 = arith.constant 0 : i32
    %c0_i32_0 = arith.constant 0 : i32
    %c0_i32_1 = arith.constant 0 : i32
    return %c0_i32, %c0_i32_0 : i32, i32
  }
  func.func @transform_5(%arg0: i32) -> (i32, i32) {
    %c0_i32 = arith.constant 0 : i32
    %c0_i32_0 = arith.constant 0 : i32
    %c0_i32_1 = arith.constant 0 : i32
    return %c0_i32, %c0_i32_0 : i32, i32
  }
  func.func @transform_6(%arg0: i32) -> (i32, i32, i32) {
    %c0_i32 = arith.constant 0 : i32
    %c0_i32_0 = arith.constant 0 : i32
    %c0_i32_1 = arith.constant 0 : i32
    return %arg0, %c0_i32, %c0_i32_0 : i32, i32, i32
  }
}

</mosaic_0001>

<bundles_post_ra>
// kernel: tpu_custom_call.1
= control target key start
LH: loop header
LB: loop body
LE: loop exit
PB: predicated region body
PF: predicated region fallthrough
CT: control target
= control target key end

     0   :  { %11 = vsyncpa [#allocation5], 0  ;;  %s1492_s0 = inlined_call_operand.vmem [shape: f32[2,4,256], index: 0, kind: input, shape index: {}]   ;;  %s1493_s1 = inlined_call_operand.hbm [shape: f32[16,72], index: 1, kind: input, shape index: {}]   ;;  %s1494_s2 = inlined_call_operand.vmem [shape: f32[8,1], index: 2, kind: input, shape index: {}]   ;;  %s1495_s3 = inlined_call_operand.vmem [shape: f32[8,72], index: 3, kind: input, shape index: {}]   ;;  %s1496_s4 = inlined_call_operand.vmem [shape: f32[8,1], index: 4, kind: input, shape index: {}]   ;;  %s1497_s5 = inlined_call_operand.vmem [shape: f32[8,1], index: 5, kind: input, shape index: {}]   ;;  %s1498_s6 = inlined_call_operand.hbm [shape: f32[2,8,256], index: 6, kind: output, shape index: {}]  }
   0x1   :  { %12 = vsyncpa [#allocation6], 0 }
   0x2   :  { %14 = vsyncpa [#allocation6 + $0x1], 0  ;;  %s1099_s21 = smov 0   ;;  %s1101_s22 = smov 0  }
   0x3   :  { %s1103_s23 = smov 0   ;;  %s1105_s24 = smov 0  }
   0x4 LB: > { %s1120_s25 = sadd.s32 4294967295, %s1048_s24   ;;  %s834_s26 = sadd.s32 4294967294, %s1048_s24   ;;  %s1048_s24 = sphi %s1105_s24, %s1550_s24   ;;  %s1044_s23 = sphi %s1103_s23, %s1549_s23   ;;  %s1040_s22 = sphi %s1101_s22, %s1548_s22   ;;  %s1036_s21 = sphi %s1099_s21, %s1547_s21  }
   0x5   : > { %s1124_s27 = sadd.s32 1, %s1048_s24   ;;  %s158_s28 = sadd.s32 1, %s1044_s23 }
   0x6   : > { %s155_s29 = ssub.s32 %s1048_s24, %s1124_s27  ;;  %p168_p0 = scmp.ne.s32.totalorder %s1044_s23, %s1040_s22 }
   0x7   : > { %p156_p1 = scmp.eq.s32.totalorder %s155_s29, 0  ;;  %p169_p2 = scmp.eq.s32.totalorder %s1120_s25, 1 }
   0x8   : > { %p174_p3 = scmp.ne.s32.totalorder %s1040_s22, %s1036_s21  ;;  %p175_p4 = scmp.eq.s32.totalorder %s834_s26, 1 }
   0x9   : > { %s1135_s30 = scalar_select %p156_p1, %s1044_s23, %s158_s28  }
   0xa   : > { %p1137_p5 = por %p169_p2, %p168_p0  ;;  %p1141_p6 = por %p175_p4, %p174_p3 }
   0xb   : > { %p835_p7 = scmp.ge.s32.totalorder %s1048_s24, 1  ;;  %p182_p8 = scmp.lt.s32.totalorder %s1048_s24, 3 }
   0xc   : > { %s1511_s8 = scalar_select %p1141_p6, 1, 0 }
   0xd   : > { %p907_p9 = scmp.eq.s32.totalorder %s1120_s25, 0  ;;  %p1148_p10 = pnand %p835_p7, %p182_p8 }
   0xe   : > { %s1050_s10 = smov [#allocation4]  }
   0xf   : > { %s194_s11 = sshll.u32 %s1050_s10, 4  ;;  %p899_p11 = pneg %p1148_p10  ;;  %s195_s11 = int_to_ptr.vmem [resolvable:$true] %s194_s11 }
  0x10   : > { %s969_s12 = scalar_lea.vmem %s195_s11, 256  ;;  %p977_p3 = scmp.lt.s32.totalorder %s195_s11, %s195_s11 }
  0x11   : > { %p900_p12 = pnand %p907_p9, %p899_p11  ;;  %p970_p0 = scmp.ne.s32.totalorder %s195_s11, %s969_s12 }
  0x12   : > { %p978_p4 = scmp.lt.s32.totalorder %s969_s12, %s969_s12 }
  0x13   : > { %p960_p13 = pneg %p900_p12 }
  0x14   : > { %p979_p6 = por %p978_p4, %p977_p3 }
  0x15   : > { %p972_p1 = pnand %p970_p0, %p960_p13 }
  0x17   : > { %p973_p2 = pneg %p972_p1 }
  0x19   : > { %p980_p7 = pnand %p979_p6, %p973_p2 }
  0x1b   : > { %983 = shalt.err (!%p980_p7)
}
  0x1c   : > { %s1051_s13 = smov 128   ;;  %s1052_s14 = smov 8  }
  0x1d   : > { %902 = dma.hbm_to_vmem [thread:$0]  (!%p900_p12), %s1493_s1, 256, %s195_s11, [#allocation5], %s1051_s13, %s1051_s13, %s1052_s14  }
  0x1e   : > { %230 = sbr.rel (%p1148_p10) target bundleno = 751 (0x2ef), region = 44 }
  0x23   : > { %1027 = dma.done.wait (%p907_p9), [#allocation5], 256  }
  0x24   : > { %1029 = vsyncadd (%p907_p9), [#allocation5], 4294967040  ;;  %p260_p8 = scmp.lt.s32.totalorder %s1120_s25, 1  ;;  %vm314_vm0 = vcmask 1043456   ;;  %s1053_s28 = smov 112   ;;  %v1058_v4 = vmov 0.0   ;;  %v265_v7 = vlaneseq }
  0x25   : > { %s1054_s29 = smov 111   ;;  %s1055_s9 = smov 113   ;;  %530 = vmatprep.mubr.f32.mxu0 %v1058_v4  ;;  %735 = vmatprep.mubr.f32.mxu1 %v1058_v4  ;;  %v1059_v5 = vmov 0   ;;  %v543_v6 = vld [vmem:[%s1494_s2] sm:$0xff] }
  0x26   : > { %s261_s17 = scalar_select %p260_p8, %s1120_s25, 1  ;;  %955 = vset.pattern.permute.xlu0 %v1059_v5  ;;  %956 = vset.pattern.permute.xlu1 %v1059_v5  ;;  %v1201_v8 = vand.u32 127, %v265_v7 }
  0x27   : > { %s1056_s10 = smov 127   ;;  %s1057_s11 = smov 1  }
  0x28   : > { %s853_s18 = sshll.u32 %s261_s17, 3  ;;  %s1060_s12 = smov 15   ;;  %v267_v9 = vadd.s32 128, %v1201_v8  ;;  %v268_v11 = vcvt.s32.f32 %v1201_v8  ;;  %vm428_vm9 = vcmp.lt.s32.totalorder %v1201_v8, 111  ;;  %vm413_vm11 = vcmp.lt.s32.totalorder %v1201_v8, 112 }
  0x29   : > { %s264_s26 = scalar_lea.vmem %s1492_s0, %s853_s18  ;;  %s1061_s13 = smov 16   ;;  %vm1499_vm15 = vcmp.lt.s32.totalorder %v1201_v8, 113 }
  0x2a   : > { %v1170_v0 = vld [vmem:[%s264_s26] sm:$0xff]  ;;  %s1062_s14 = smov 17   ;;  %v269_v10 = vcvt.s32.f32 %v267_v9  ;;  %v270_v13 = vmul.f32 0.0625, %v268_v11  ;;  %s1063_s18 = smov [#allocation7]  }
  0x2b   : > { %v315_v1 = vsel %vm314_vm0, %v1170_v0, 0.0  ;;  %v1176_v2 = vcombine.high %v1170_v0, %v1170_v0 }
  0x2c   : > { %409 = vrot.lane.b32.xlu1 %v315_v1, %s1053_s28  ;;  %424 = vrot.lane.b32.xlu0 %v315_v1, %s1054_s29  ;;  %v271_v12 = vmul.f32 0.0625, %v269_v10  ;;  %v889_v15 = vtrunc.f32 %v270_v13  ;;  %v440_v13 = vld [vmem:[#allocation4 + $0x8] sm:$0xff] }
  0x2d   : > { %v316_v3 = vsel %vm314_vm0, %v1176_v2, 0.0 }
  0x2e   : > { %v891_v14 = vtrunc.f32 %v271_v12  ;;  %v890_v17 = vcvt.f32.s32 %v889_v15  ;;  %v439_v12 = vld [vmem:[#allocation4] sm:$0xff] }
  0x30   : > { %394 = vrot.lane.b32.xlu0 %v315_v1, %s1055_s9  ;;  %411 = vrot.lane.b32.xlu1 %v316_v3, %s1053_s28  ;;  %v892_v16 = vcvt.f32.s32 %v891_v14  ;;  %v274_v19 = vmul.u32 16, %v890_v17  ;;  %v843_v23 = vadd.s32 4294967295, %v890_v17 }
  0x32   : > { %v275_v18 = vmul.u32 16, %v892_v16  ;;  %v276_v21 = vsub.s32 %v1201_v8, %v274_v19  ;;  %v844_v22 = vadd.s32 4294967295, %v892_v16 }
  0x34   : > { %396 = vrot.lane.b32.xlu1 %v316_v3, %s1055_s9  ;;  %426 = vrot.lane.b32.xlu0 %v316_v3, %s1054_s29  ;;  %v277_v20 = vsub.s32 %v267_v9, %v275_v18  ;;  %vm278_vm2 = vcmp.lt.s32.totalorder %v276_v21, 0  ;;  %vm284_vm4 = vcmp.ge.s32.totalorder %v276_v21, 16  ;;  %v662_v21 = vld [vmem:[%s1496_s4] sm:$0xff] }
  0x35   : > { %v282_v25 = vsel %vm278_vm2, %v843_v23, %v890_v17  ;;  %vm1502_vm2 = vcmp.lt.s32.totalorder %v1201_v8, 127 }
  0x36   : > { %vm279_vm1 = vcmp.lt.s32.totalorder %v277_v20, 0  ;;  %vm285_vm3 = vcmp.ge.s32.totalorder %v277_v20, 16  ;;  %v286_v27 = vadd.s32 1, %v282_v25 }
  0x37   : > { %v283_v24 = vsel %vm279_vm1, %v844_v22, %v892_v16 }
  0x38   : > { %381 = vrot.lane.b32.xlu1 %v316_v3, %s1056_s10  ;;  %379 = vrot.lane.b32.xlu0 %v315_v1, %s1056_s10  ;;  %v287_v26 = vadd.s32 1, %v283_v24  ;;  %v1208_v29 = vsel %vm284_vm4, %v286_v27, %v282_v25  ;;  %vm1503_vm4 = vcmp.lt.s32.totalorder %v1201_v8, 1 }
  0x39   : > { %v290_v31 = vmul.u32 16, %v1208_v29  ;;  %vm1500_vm7 = vcmp.lt.s32.totalorder %v1208_v29, 15 }
  0x3a   : > { %v1206_v28 = vsel %vm285_vm3, %v287_v26, %v283_v24 }
  0x3b   : > { %v291_v30 = vmul.u32 16, %v1206_v28  ;;  %v1215_v35 = vsub.s32 %v1201_v8, %v290_v31  ;;  %vm1501_vm5 = vcmp.lt.s32.totalorder %v1206_v28, 15 }
  0x3c   : > { %364 = vrot.lane.b32.xlu1 %v316_v3, %s1057_s11  ;;  %362 = vrot.lane.b32.xlu0 %v315_v1, %s1057_s11 }
  0x3d   : > { %v1212_v34 = vsub.s32 %v267_v9, %v291_v30  ;;  %vm1505_vm8 = vcmp.lt.s32.totalorder %v1215_v35, 15  ;;  %vm298_vm14 = vcmp.ge.s32.totalorder %v1215_v35, 1 }
  0x3e   : > { %vm1235_vm12 = vmand %vm1500_vm7, %vm1505_vm8 }
  0x3f   : > { %vm301_vm6 = vcmp.lt.s32.totalorder %v1212_v34, 15  ;;  %vm299_vm13 = vcmp.ge.s32.totalorder %v1212_v34, 1  ;;  %vm1269_vm3 = vmand %vm1500_vm7, %vm298_vm14 }
  0x40   : > { %349 = vrot.lane.b32.xlu1 %v316_v3, %s1060_s12  ;;  %347 = vrot.lane.b32.xlu0 %v315_v1, %s1060_s12  ;;  %vm1226_vm10 = vmand %vm1501_vm5, %vm301_vm6 }
  0x41   : > { %vm1256_vm1 = vmand %vm1501_vm5, %vm299_vm13 }
  0x44   : > { %334 = vrot.lane.b32.xlu1 %v316_v3, %s1061_s13  ;;  %332 = vrot.lane.b32.xlu0 %v315_v1, %s1061_s13 }
  0x48   : > { %319 = vrot.lane.b32.xlu1 %v316_v3, %s1062_s14  ;;  %317 = vrot.lane.b32.xlu0 %v315_v1, %s1062_s14 }
  0x4c   : > { %546 = vperm.xlu0 %955, %v543_v6  }
  0x9e   : > { %v410_v32 = vpop.permute.xlu1 %409  ;;  %v425_v33 = vpop.permute.xlu0 %424 }
  0xa2   : > { %v395_v36 = vpop.permute.xlu0 %394  ;;  %v412_v37 = vpop.permute.xlu1 %411 }
  0xa3   : > { %v415_v44 = vsel %vm413_vm11, %v412_v37, %v410_v32  ;;  %v414_v46 = vsel %vm413_vm11, %v410_v32, %v412_v37 }
  0xa6   : > { %v397_v39 = vpop.permute.xlu1 %396  ;;  %v427_v40 = vpop.permute.xlu0 %426 }
  0xa7   : > { %v430_v42 = vsel %vm428_vm9, %v427_v40, %v425_v33  ;;  %v429_v43 = vsel %vm428_vm9, %v425_v33, %v427_v40  ;;  %v400_v50 = vsel %vm1499_vm15, %v397_v39, %v395_v36  ;;  %v399_v51 = vsel %vm1499_vm15, %v395_v36, %v397_v39 }
  0xa8   : > { %855 = vmatprep.subr.msk.mxu0 %vm1226_vm10, %v430_v42  ;;  %vm1507_vm15 = vcmp.ge.s32.totalorder %v1206_v28, 1 }
  0xa9   : > { %856 = vmatpush1.msk.msra.mxu0 %vm1235_vm12, %v429_v43 }
  0xaa   : > { %v382_v47 = vpop.permute.xlu1 %381  ;;  %857 = vmatprep.subr.msk.mxu0 %vm1501_vm5, %v415_v44  ;;  %v380_v48 = vpop.permute.xlu0 %379  ;;  %vm1504_vm5 = vcmp.lt.s32.totalorder %v1201_v8, 15 }
  0xab   : > { %858 = vmatpush1.msk.msra.mxu0 %vm1500_vm7, %v414_v46  ;;  %v385_v52 = vsel %vm1502_vm2, %v382_v47, %v380_v48  ;;  %v384_v53 = vsel %vm1502_vm2, %v380_v48, %v382_v47  ;;  %vm294_vm7 = vcmp.ge.s32.totalorder %v1208_v29, 1  ;;  %vm1305_vm2 = vmand %vm1507_vm15, %vm301_vm6 }
  0xac   : > { %859 = vmatprep.subr.msk.mxu0 %vm1256_vm1, %v400_v50 }
  0xad   : > { %860 = vmatpush1.msk.msra.mxu0 %vm1269_vm3, %v399_v51 }
  0xae   : > { %v365_v54 = vpop.permute.xlu1 %364  ;;  %861 = vmatprep.subr.msk.mxu0 %vm301_vm6, %v385_v52  ;;  %v363_v55 = vpop.permute.xlu0 %362 }
  0xaf   : > { %862 = vmatpush1.msk.msra.mxu0 %vm1505_vm8, %v384_v53  ;;  %v367_v56 = vsel %vm1503_vm4, %v363_v55, %v365_v54  ;;  %v368_v58 = vsel %vm1503_vm4, %v365_v54, %v363_v55  ;;  %vm1506_vm4 = vcmp.lt.s32.totalorder %v1201_v8, 16 }
  0xb0   : > { %863 = vmatprep.subr.msk.mxu0 %vm314_vm0, %v1176_v2 }
  0xb1   : > { %864 = vmatpush1.msk.msra.mxu0 %vm314_vm0, %v1170_v0  ;;  %vm1317_vm0 = vmand %vm294_vm7, %vm1505_vm8 }
  0xb2   : > { %v350_v59 = vpop.permute.xlu1 %349  ;;  %865 = vmatprep.subr.msk.mxu0 %vm299_vm13, %v367_v56  ;;  %v348_v60 = vpop.permute.xlu0 %347  ;;  %vm1345_vm8 = vmand %vm1507_vm15, %vm299_vm13  ;;  %v643_v56 = vld [vmem:[%s1495_s3] sm:$0xff] }
  0xb3   : > { %v352_v62 = vsel %vm1504_vm5, %v348_v60, %v350_v59  ;;  %v353_v63 = vsel %vm1504_vm5, %v350_v59, %v348_v60  ;;  %866 = vmatpush1.msk.msra.mxu0 %vm298_vm14, %v368_v58  ;;  %vm1509_vm5 = vcmp.lt.s32.totalorder %v1201_v8, 17 }
  0xb4   : > { %867 = vmatprep.subr.msk.mxu0 %vm1305_vm2, %v352_v62 }
  0xb5   : > { %868 = vmatpush1.msk.msra.mxu0 %vm1317_vm0, %v353_v63 }
  0xb6   : > { %v335_v0 = vpop.permute.xlu1 %334  ;;  %v333_v1 = vpop.permute.xlu0 %332 }
  0xb7   : > { %v337_v2 = vsel %vm1506_vm4, %v333_v1, %v335_v0  ;;  %v338_v3 = vsel %vm1506_vm4, %v335_v0, %v333_v1  ;;  %vm1353_vm4 = vmand %vm294_vm7, %vm298_vm14 }
  0xb8   : > { %869 = vmatprep.subr.msk.mxu0 %vm1507_vm15, %v337_v2  ;;  %vm1508_vm15 = vcmask 588800  }
  0xb9   : > { %870 = vmatpush1.msk.msra.mxu0 %vm294_vm7, %v338_v3 }
  0xba   : > { %v320_v6 = vpop.permute.xlu1 %319  ;;  %v318_v7 = vpop.permute.xlu0 %317 }
  0xbb   : > { %v322_v10 = vsel %vm1509_vm5, %v318_v7, %v320_v6  ;;  %v323_v11 = vsel %vm1509_vm5, %v320_v6, %v318_v7  ;;  %vm1530_vm5 = vcmp.lt.s32.totalorder %v1208_v29, 15 }
  0xbc   : > { %871 = vmatprep.subr.msk.mxu0 %vm1345_vm8, %v322_v10 }
  0xbd   : > { %872 = vmatpush1.msk.msra.mxu0 %vm1353_vm4, %v323_v11 }
  0xbe   : > { %845 = vmatmul.mubr.msk.f32.vlgmr.msra.gmra.mxu0 %vm1508_vm15, %v439_v12 }
  0xbf   : > { %536 = vmatprep.mubr.f32.mxu0 %v1058_v4  ;;  %v553_v4 = vld [vmem:[%s1497_s5] sm:$0xff] }
  0xc2   : > { %846 = vmatmul.mubr.msk.f32.gmra.mxu0 %vm1508_vm15, %v440_v13  ;;  %vm1529_vm15 = vcmp.lt.s32.totalorder %v1206_v28, 15 }
  0xc7   : > { %v547_v14 = vpop.permute.xlu0 %546 }
 0x17e   : > { %v532_v15 = vpop.f32.mrf.mxu0 }
 0x17f   : > { %v549_v16 = vadd.f32 %v547_v14, %v532_v15 }
 0x180   : > { %v534_v17 = vpop.f32.mrf.mxu0 }
 0x181   : > { %v551_v18 = vmax.f32 %v549_v16, 0.0  ;;  %v550_v19 = vadd.f32 %v547_v14, %v534_v17 }
 0x183   : > { %623 = vrot.lane.b32.xlu0 %v551_v18, %s1053_s28  ;;  %633 = vrot.lane.b32.xlu1 %v551_v18, %s1054_s29  ;;  %v552_v20 = vmax.f32 %v550_v19, 0.0 }
 0x187   : > { %613 = vrot.lane.b32.xlu0 %v551_v18, %s1055_s9  ;;  %635 = vrot.lane.b32.xlu1 %v552_v20, %s1054_s29  ;;  %s257_s29 = sand.u32 1, %s1040_s22  }
 0x188   : > { %s749_s16 = scalar_lea.sflag [#allocation6], %s257_s29 }
 0x18b   : > { %603 = vrot.lane.b32.xlu0 %v551_v18, %s1056_s10  ;;  %625 = vrot.lane.b32.xlu1 %v552_v20, %s1053_s28 }
 0x18f   : > { %591 = vrot.lane.b32.xlu0 %v551_v18, %s1057_s11  ;;  %615 = vrot.lane.b32.xlu1 %v552_v20, %s1055_s9  ;;  %s840_s9 = sshll.u32 %s257_s29, 4 }
 0x193   : > { %581 = vrot.lane.b32.xlu0 %v551_v18, %s1060_s12  ;;  %605 = vrot.lane.b32.xlu1 %v552_v20, %s1056_s10  ;;  %s854_s10 = sshll.u32 %s1120_s25, 8  ;;  %s988_s25 = sshll.u32 %s1063_s18, 4  ;;  %s989_s25 = int_to_ptr.vmem [resolvable:$false] %s988_s25 }
 0x194   : > { %s761_s15 = scalar_lea.hbm %s1498_s6, %s854_s10  ;;  %s990_s19 = scalar_lea.vmem %s989_s25, 512 }
 0x197   : > { %571 = vrot.lane.b32.xlu0 %v551_v18, %s1061_s13  ;;  %593 = vrot.lane.b32.xlu1 %v552_v20, %s1057_s11  ;;  %s259_s11 = scalar_lea.vmem [#allocation7], %s840_s9 }
 0x19b   : > { %561 = vrot.lane.b32.xlu0 %v551_v18, %s1062_s14  ;;  %583 = vrot.lane.b32.xlu1 %v552_v20, %s1060_s12  ;;  %s763_s12 = sshll.u32 %s259_s11, 4  ;;  %s764_s12 = int_to_ptr.vmem [resolvable:$true] %s763_s12 }
 0x19c   : > { %s984_s17 = scalar_lea.vmem %s764_s12, 256  ;;  %p991_p11 = scmp.lt.s32.totalorder %s764_s12, %s989_s25 }
 0x19d   : > { %p985_p6 = scmp.ne.s32.totalorder %s764_s12, %s984_s17  ;;  %p992_p12 = scmp.lt.s32.totalorder %s990_s19, %s984_s17 }
 0x19f   : > { %556 = vperm.xlu0 %955, %v553_v4   ;;  %573 = vrot.lane.b32.xlu1 %v552_v20, %s1061_s13  ;;  %p986_p9 = pnand %p985_p6, %p1137_p5  ;;  %p993_p13 = por %p992_p12, %p991_p11 }
 0x1a1   : > { %p987_p10 = pneg %p986_p9 }
 0x1a3   : > { %563 = vrot.lane.b32.xlu1 %v552_v20, %s1062_s14  ;;  %p994_p0 = pnand %p993_p13, %p987_p10 }
 0x1a7   : > { %665 = vperm.xlu1 %956, %v662_v21  }
 0x1f5   : > { %v624_v22 = vpop.permute.xlu0 %623  ;;  %v634_v23 = vpop.permute.xlu1 %633 }
 0x1f9   : > { %v614_v24 = vpop.permute.xlu0 %613  ;;  %v636_v25 = vpop.permute.xlu1 %635 }
 0x1fa   : > { %v638_v26 = vsel %vm428_vm9, %v636_v25, %v634_v23  ;;  %v637_v27 = vsel %vm428_vm9, %v634_v23, %v636_v25  ;;  %vm1531_vm9 = vcmp.lt.s32.totalorder %v1201_v8, 113 }
 0x1fb   : > { %873 = vmatprep.subr.msk.mxu1 %vm1226_vm10, %v638_v26  ;;  %vm1532_vm10 = vmmov %vm1531_vm9 }
 0x1fc   : > { %874 = vmatpush1.msk.msra.mxu1 %vm1235_vm12, %v637_v27  ;;  %vm1535_vm12 = vcmp.lt.s32.totalorder %v1215_v35, 15 }
 0x1fd   : > { %v604_v30 = vpop.permute.xlu0 %603  ;;  %v626_v31 = vpop.permute.xlu1 %625 }
 0x1fe   : > { %v627_v32 = vsel %vm413_vm11, %v624_v22, %v626_v31  ;;  %v628_v33 = vsel %vm413_vm11, %v626_v31, %v624_v22  ;;  %vm1533_vm11 = vcmp.lt.s32.totalorder %v1201_v8, 127 }
 0x1ff   : > { %875 = vmatprep.subr.msk.mxu1 %vm1529_vm15, %v628_v33  ;;  %vm1536_vm15 = vcmp.lt.s32.totalorder %v1201_v8, 1 }
 0x200   : > { %876 = vmatpush1.msk.msra.mxu1 %vm1530_vm5, %v627_v32  ;;  %vm1534_vm5 = vmmov %vm1533_vm11 }
 0x201   : > { %v616_v36 = vpop.permute.xlu1 %615  ;;  %v592_v39 = vpop.permute.xlu0 %591 }
 0x202   : > { %v617_v37 = vsel %vm1531_vm9, %v614_v24, %v616_v36  ;;  %v618_v38 = vsel %vm1532_vm10, %v616_v36, %v614_v24  ;;  %vm1542_vm9 = vcmp.ge.s32.totalorder %v1206_v28, 1  ;;  %v538_v28 = vpop.f32.mrf.mxu0 }
 0x203   : > { %877 = vmatprep.subr.msk.mxu1 %vm1256_vm1, %v618_v38  ;;  %vm1537_vm1 = vmmov %vm1536_vm15 }
 0x204   : > { %878 = vmatpush1.msk.msra.mxu1 %vm1269_vm3, %v617_v37 }
 0x205   : > { %v606_v40 = vpop.permute.xlu1 %605  ;;  %v582_v43 = vpop.permute.xlu0 %581 }
 0x206   : > { %v607_v41 = vsel %vm1533_vm11, %v604_v30, %v606_v40  ;;  %v608_v42 = vsel %vm1534_vm5, %v606_v40, %v604_v30 }
 0x207   : > { %879 = vmatprep.subr.msk.mxu1 %vm301_vm6, %v608_v42  ;;  %vm1538_vm6 = vcmp.lt.s32.totalorder %v1201_v8, 15 }
 0x208   : > { %880 = vmatpush1.msk.msra.mxu1 %vm1535_vm12, %v607_v41  ;;  %vm1539_vm3 = vmmov %vm1538_vm6 }
 0x209   : > { %693 = vmatprep.subr.mxu1 %v552_v20  ;;  %v594_v44 = vpop.permute.xlu1 %593  ;;  %v572_v50 = vpop.permute.xlu0 %571 }
 0x20a   : > { %v595_v45 = vsel %vm1536_vm15, %v592_v39, %v594_v44  ;;  %v596_v46 = vsel %vm1537_vm1, %v594_v44, %v592_v39  ;;  %694 = vmatpush1.msra.mxu1 %v551_v18 }
 0x20b   : > { %881 = vmatprep.subr.msk.mxu1 %vm299_vm13, %v595_v45  ;;  %vm1540_vm13 = vcmp.lt.s32.totalorder %v1201_v8, 16 }
 0x20c   : > { %882 = vmatpush1.msk.msra.mxu1 %vm298_vm14, %v596_v46  ;;  %vm1541_vm14 = vmmov %vm1540_vm13 }
 0x20d   : > { %v584_v47 = vpop.permute.xlu1 %583  ;;  %v562_v52 = vpop.permute.xlu0 %561 }
 0x20e   : > { %v585_v48 = vsel %vm1538_vm6, %v582_v43, %v584_v47  ;;  %v586_v49 = vsel %vm1539_vm3, %v584_v47, %v582_v43 }
 0x20f   : > { %883 = vmatprep.subr.msk.mxu1 %vm1305_vm2, %v585_v48  ;;  %vm1543_vm2 = vcmp.lt.s32.totalorder %v1201_v8, 17  ;;  %v540_v8 = vpop.f32.mrf.mxu0 }
 0x210   : > { %884 = vmatpush1.msk.msra.mxu1 %vm1317_vm0, %v586_v49  ;;  %vm1544_vm0 = vmmov %vm1543_vm2 }
 0x211   : > { %v574_v34 = vpop.permute.xlu1 %573 }
 0x212   : > { %v575_v35 = vsel %vm1540_vm13, %v572_v50, %v574_v34  ;;  %v576_v51 = vsel %vm1541_vm14, %v574_v34, %v572_v50 }
 0x213   : > { %885 = vmatprep.subr.msk.mxu1 %vm1542_vm9, %v575_v35 }
 0x214   : > { %886 = vmatpush1.msk.msra.mxu1 %vm294_vm7, %v576_v51  ;;  %vm1545_vm7 = vcmask 588800  }
 0x215   : > { %v564_v53 = vpop.permute.xlu1 %563 }
 0x216   : > { %v565_v54 = vsel %vm1543_vm2, %v562_v52, %v564_v53  ;;  %v566_v55 = vsel %vm1544_vm0, %v564_v53, %v562_v52 }
 0x217   : > { %887 = vmatprep.subr.msk.mxu1 %vm1345_vm8, %v565_v54 }
 0x218   : > { %888 = vmatpush1.msk.msra.mxu1 %vm1353_vm4, %v566_v55 }
 0x219   : > { %847 = vmatmul.mubr.msk.f32.vlgmr.msra.gmra.mxu1 %vm1545_vm7, %v643_v56 }
 0x21a   : > { %v557_v29 = vpop.permute.xlu0 %556 }
 0x21b   : > { %v559_v59 = vadd.f32 %v557_v29, %v538_v28  ;;  %v560_v62 = vadd.f32 %v557_v29, %v540_v8 }
 0x222   : > { %v666_v57 = vpop.permute.xlu1 %665 }
 0x2d9   : > { %v737_v58 = vpop.f32.mrf.mxu1 }
 0x2da   : > { %v738_v60 = vadd.f32 %v737_v58, %v666_v57 }
 0x2db   : > { %v739_v61 = vpop.f32.mrf.mxu1 }
 0x2dc   : > { %v742_v63 = vadd.f32 %v738_v60, %v559_v59  ;;  %v740_v0 = vadd.f32 %v739_v61, %v666_v57 }
 0x2de   : > { %v744_v1 = vmax.f32 %v742_v63, 0.0  ;;  %v743_v2 = vadd.f32 %v740_v0, %v560_v62 }
 0x2e0   : > { %746 = vst [vmem:[%s259_s11] sm:$0xff] %v744_v1  ;;  %v745_v3 = vmax.f32 %v743_v2, 0.0 }
 0x2e2   : > { %747 = vst [vmem:[%s259_s11 + $0x8] sm:$0xff] %v745_v3 }
 0x2e3   : > { %997 = shalt.err (!%p994_p0)
}
 0x2e4   : > { %s998_s20 = scalar_lea.hbm %s761_s15, 256  ;;  %s1002_s29 = scalar_lea.hbm %s1498_s6, 512 }
 0x2e5   : > { %p999_p1 = scmp.ne.s32.totalorder %s761_s15, %s998_s20  ;;  %p1003_p4 = scmp.lt.s32.totalorder %s761_s15, %s1498_s6 }
 0x2e6   : > { %p1004_p7 = scmp.lt.s32.totalorder %s1002_s29, %s998_s20 }
 0x2e7   : > { %p1000_p2 = pnand %p999_p1, %p1137_p5 }
 0x2e8   : > { %p1005_p8 = por %p1004_p7, %p1003_p4 }
 0x2e9   : > { %p1001_p3 = pneg %p1000_p2 }
 0x2eb   : > { %p1006_p6 = pnand %p1005_p8, %p1001_p3 }
 0x2ed   : > { %1009 = shalt.err (!%p1006_p6)
}
 0x2ee   : > { %897 = dma.vmem_to_hbm [thread:$0]  (%p1137_p5), %s764_s12, 256, %s761_s15, %s749_s16  }
 0x2ef PF: > { %p909_p9 = scmp.ge.s32.totalorder %s1048_s24, 2  ;;  %s775_s11 = sand.u32 1, %s1036_s21  }
 0x2f0   : > { %p1546_p10 = scmp.ne.s32.totalorder %s1511_s8, 0  ;;  %s776_s13 = scalar_lea.sflag [#allocation6], %s775_s11 }
 0x2f2   : > { %p904_p11 = pnand %p909_p9, %p1546_p10 }
 0x2f4   : > { %p905_p12 = pneg %p904_p11 }
 0x2f6   : > { %1031 = dma.done.wait (%p905_p12), %s776_s13, 256  }
 0x2f7   : > { %1033 = vsyncadd (%p905_p12), %s776_s13, 4294967040  ;;  %p17_p13 = scmp.ge.s32.totalorder %s1124_s27, 4   ;;  %s1547_s21 = smov %s1040_s22 }
 0x2f8   : > { %s1548_s22 = smov %s1044_s23  ;;  %s1549_s23 = smov %s1135_s30 }
 0x2f9   : > { %s1550_s24 = smov %s1124_s27  ;;  %19 = sbr.rel (!%p17_p13) target bundleno = 4 (0x4), region = 84 }
 0x2fe   :  { %781 = vsyncpa [#allocation5], 1 }
 0x2ff   :  { %783 = vsyncpa [#allocation5 + $0x1], 1 }
 0x300   :  { %784 = vsyncpa [#allocation6], 1 }
 0x301   :  { %786 = vsyncpa [#allocation6 + $0x1], 1 }

</bundles_post_ra>
